<compile_context>
chip_gen: v7x
topology: tpu7x:2x2x1
jax: 0.10.0
libtpu: 0.0.40
codegen_flags: <defaults>
</compile_context>

<pallas_src>
import jax
import jax.numpy as jnp
from jax.experimental import pallas as pl
from jax.experimental.pallas import tpu as pltpu

# class weights used by the module: torch.FloatTensor([0.9, 1.1])
_W0 = 0.9
_W1 = 1.1


# ----------------------------------------------------------------------------
# kernel
# ----------------------------------------------------------------------------
def _softplus(z):
    # numerically stable log(1 + exp(z)); exp/log go to the EUP slot.
    return jnp.maximum(z, 0.0) + jnp.log(1.0 + jnp.exp(-jnp.abs(z)))


def _fused_loss_kernel(diff_ref, mini_diff_ref, tgt_ref, rh_ref, rwt_ref,
                       r10h_ref, r10wt_ref, out_ref, dw_scr, mini_scr):
    # Per grid step (b, t):
    #  diff_ref      (1, Hs, Ws) bf16  low-res logit difference (class1-class0)
    #  mini_diff_ref (1, 10, 10) f32   pred_logits difference, reshaped
    #  tgt_ref       (1, TH, W)  bf16  row tile of the {0,1} GT mask
    #  rh_ref        (TH, Hs)    bf16  row tile of the row-upsample matrix
    #  rwt_ref       (Ws, W)     bf16  col-upsample matrix, transposed
    #  r10h_ref      (1, 16, TH) bf16  row tile of zero-padded (16,H) row-downsample
    #  r10wt_ref     (W, 10)     bf16  col-downsample matrix, transposed
    #  out_ref       (1, 8, 128) f32   per-batch partials: rows 0..3 = n1,d1,n2,d2
    #  dw_scr        (Hs, W)     bf16  scratch: diff @ rwt (once per batch element)
    #  mini_scr      (16, W)     f32   scratch: sum_t r10h_tile @ (1 - tgt_tile)
    t = pl.program_id(1)
    nt = pl.num_programs(1)
    _, th, w = tgt_ref.shape

    @pl.when(t == 0)
    def _init():
        dw = jnp.dot(diff_ref[0], rwt_ref[...],
                     preferred_element_type=jnp.float32)          # (Hs, W)
        dw_scr[...] = dw.astype(jnp.bfloat16)
        mini_scr[...] = jnp.zeros_like(mini_scr)
        out_ref[...] = jnp.zeros_like(out_ref)

    # ---- full-resolution mask CE for this row tile --------------------------
    d = jnp.dot(rh_ref[...], dw_scr[...],
                preferred_element_type=jnp.float32)               # (TH, W) f32
    tgt = tgt_ref[0]                                              # (TH, W) bf16 {0,1}
    y = tgt.astype(jnp.float32)
    ce = _softplus(d * (1.0 - 2.0 * y))          # softplus(d) if y==0 else softplus(-d)
    # w_y = 0.9 + 0.2*y folded into arithmetic (no weight plane, no selects).
    num1 = _W0 * jnp.sum(ce) + (_W1 - _W0) * jnp.sum(y * ce)
    den1 = _W0 * float(th * w) + (_W1 - _W0) * jnp.sum(y)

    rows = jax.lax.broadcasted_iota(jnp.int32, (8, 128), 0)
    contrib = (jnp.where(rows == 0, num1, 0.0)
               + jnp.where(rows == 1, den1, 0.0))
    out_ref[...] += contrib[None]

    # ---- minimap target: accumulate exact complement row-downsample ---------
    comp = 1.0 - tgt                                              # bf16, {0,1}
    mini_scr[...] += jnp.dot(r10h_ref[0], comp,
                             preferred_element_type=jnp.float32)  # (16, W)

    # ---- minimap CE, finalized once per batch element ------------------------
    @pl.when(t == nt - 1)
    def _finish():
        mini_c = jnp.dot(mini_scr[...].astype(jnp.bfloat16), r10wt_ref[...],
                         preferred_element_type=jnp.float32)      # (16, 10)
        mini_c = mini_c[:10, :]                                   # (10, 10)
        # Sum of non-negative terms == 0 iff every contributing GT pixel is 1,
        # i.e. exactly PyTorch's floor(bilinear(tgt)) >= 1 label.
        ym = jnp.where(mini_c <= 0.0, 1.0, 0.0)                   # (10, 10) f32
        dm = mini_diff_ref[0]                                     # (10, 10) f32
        cem = _softplus(dm * (1.0 - 2.0 * ym))
        num2 = _W0 * jnp.sum(cem) + (_W1 - _W0) * jnp.sum(ym * cem)
        den2 = _W0 * 100.0 + (_W1 - _W0) * jnp.sum(ym)
        contrib2 = (jnp.where(rows == 2, num2, 0.0)
                    + jnp.where(rows == 3, den2, 0.0))
        out_ref[...] += contrib2[None]


# ----------------------------------------------------------------------------
# wrapper
# ----------------------------------------------------------------------------
def _bilinear_matrix(in_size, out_size):
    """PyTorch F.interpolate(mode='bilinear', align_corners=False) as (out, in)."""
    scale = in_size / out_size
    i = jnp.arange(out_size, dtype=jnp.float32)
    src = (i + 0.5) * scale - 0.5
    src = jnp.maximum(src, 0.0)
    x0 = jnp.clip(jnp.floor(src).astype(jnp.int32), 0, in_size - 1)
    x1 = jnp.minimum(x0 + 1, in_size - 1)
    lam = src - x0.astype(jnp.float32)
    rows = jnp.arange(out_size)
    mat = jnp.zeros((out_size, in_size), jnp.float32)
    mat = mat.at[rows, x0].add(1.0 - lam)
    mat = mat.at[rows, x1].add(lam)
    return mat


def _vmem_capacity_bytes():
    try:
        return int(pltpu.get_tpu_info().vmem_capacity_bytes)
    except Exception:
        return 64 << 20          # conservative: v7x per-TensorCore VMEM


def _pick_row_tile(H, W, row_tile=None):
    """Row-tile height: multiple of 8 (or H), divides H, ~<=1MiB per f32 plane."""
    if row_tile is not None:
        row_tile = int(row_tile)
        assert H % row_tile == 0 and (row_tile % 8 == 0 or row_tile == H)
        return row_tile
    if H % 8 != 0:
        return H                 # fall back to a single tile
    budget_rows = max(8, (1 << 20) // max(4 * W, 1))
    best = 8
    for cand in range(8, H + 1, 8):
        if H % cand == 0 and cand <= budget_rows:
            best = cand
    return best


def _loss_mask_impl(pred_masks, pred_logits, target_masks, row_tile=None):
    pred_masks = pred_masks.astype(jnp.float32)      # (B, 2, Hs, Ws)
    pred_logits = pred_logits.astype(jnp.float32)    # (B, 100, 2)
    B, _, Hs, Ws = pred_masks.shape
    H, W = target_masks.shape[-2:]
    assert pred_logits.shape[1] == 100, "minimap CE expects 100 queries (10x10)"

    TH = _pick_row_tile(H, W, row_tile)
    NT = H // TH

    # 2-class CE only depends on the logit difference.
    diff = (pred_masks[:, 1] - pred_masks[:, 0]).astype(jnp.bfloat16)             # (B, Hs, Ws)
    mini_diff = (pred_logits[:, :, 1] - pred_logits[:, :, 0]).reshape(B, 10, 10)  # (B, 10, 10)

    tgt_bf16 = target_masks.astype(jnp.bfloat16)     # exact for a {0,1} mask
    # TODO(synk): stream the target as int8 for an extra 2x HBM saving on v5e.

    # Resize matrices (out, in); everything bf16 — the complement-downsample
    # label only depends on exact zero-ness of non-negative sums.
    rh = _bilinear_matrix(Hs, H).astype(jnp.bfloat16)         # (H, Hs)
    rwt = _bilinear_matrix(Ws, W).T.astype(jnp.bfloat16)      # (Ws, W)
    r10h = _bilinear_matrix(H, 10).astype(jnp.bfloat16)       # (10, H)
    r10h = jnp.concatenate([r10h, jnp.zeros((6, H), jnp.bfloat16)], axis=0)  # (16, H)
    r10h_t = r10h.reshape(16, NT, TH).transpose(1, 0, 2)      # (NT, 16, TH)
    r10wt = _bilinear_matrix(W, 10).T.astype(jnp.bfloat16)    # (W, 10)

    # VMEM budget per grid step (row tile), clamped to this chip generation.
    est_vmem = int(
        10 * TH * W * 4                                   # f32 tile temporaries
        + 2 * 2 * TH * W                                  # double-buffered bf16 target tile
        + 2 * 2 * (TH * Hs + Ws * W + Hs * Ws + 16 * TH + W * 10)  # bf16 inputs (x2 buf)
        + 2 * 2 * 10 * 10 * 4                             # mini_diff
        + 2 * Hs * W + 4 * 16 * W                         # scratches
        + 2 * 4 * 8 * 128                                 # output block
        + (4 << 20))
    cap = _vmem_capacity_bytes()
    vmem_limit = int(min(max(est_vmem, 32 << 20), cap - (8 << 20)))

    out = pl.pallas_call(
        _fused_loss_kernel,
        out_shape=jax.ShapeDtypeStruct((B, 8, 128), jnp.float32),
        grid_spec=pltpu.PrefetchScalarGridSpec(
            num_scalar_prefetch=0,
            grid=(B, NT),
            in_specs=[
                pl.BlockSpec((1, Hs, Ws), lambda b, t: (b, 0, 0)),   # diff
                pl.BlockSpec((1, 10, 10), lambda b, t: (b, 0, 0)),   # mini_diff
                pl.BlockSpec((1, TH, W), lambda b, t: (b, t, 0)),    # target row tile
                pl.BlockSpec((TH, Hs), lambda b, t: (t, 0)),         # rh row tile
                pl.BlockSpec((Ws, W), lambda b, t: (0, 0)),          # rwt
                pl.BlockSpec((1, 16, TH), lambda b, t: (t, 0, 0)),   # r10h tile
                pl.BlockSpec((W, 10), lambda b, t: (0, 0)),          # r10wt
            ],
            out_specs=pl.BlockSpec((1, 8, 128), lambda b, t: (b, 0, 0)),
            scratch_shapes=[
                pltpu.VMEM((Hs, W), jnp.bfloat16),    # diff @ rwt, reused across tiles
                pltpu.VMEM((16, W), jnp.float32),     # minimap row-downsample partial
            ],
        ),
        compiler_params=pltpu.CompilerParams(
            dimension_semantics=("parallel", "arbitrary"),
            vmem_limit_bytes=vmem_limit),
    )(diff, mini_diff, tgt_bf16, rh, rwt, r10h_t, r10wt)

    # tiny final reduction (weighted-CE 'mean' over the whole batch)
    num1 = jnp.sum(out[:, 0, 0])
    den1 = jnp.sum(out[:, 1, 0])
    num2 = jnp.sum(out[:, 2, 0])
    den2 = jnp.sum(out[:, 3, 0])
    return num1 / den1 + 0.2 * (num2 / den2)


_loss_mask = jax.jit(_loss_mask_impl, static_argnames=("row_tile",))


# ----------------------------------------------------------------------------
# module
# ----------------------------------------------------------------------------
class ReferringCriterion:
    def __init__(self, weight_dict, losses, row_tile=None):
        self.weight_dict = weight_dict
        self.losses = losses
        self.row_tile = row_tile    # optional override of the row-tile heuristic

    def loss_masks_refer(self, outputs, targets):
        src_masks = outputs['pred_masks']       # (B, 2, Hs, Ws)
        pred_logits = outputs['pred_logits']    # (B, 100, 2)
        # nested_tensor_from_tensor_list: all GT masks share one shape -> stack.
        # TODO(synk): ragged-mask padding of nested tensors is not reproduced.
        target_masks = jnp.stack(
            [t['gt_mask_merged'] for t in targets]).astype(jnp.float32)   # (B,1,H,W)
        target_masks = target_masks[:, 0]                                 # (B, H, W)
        loss_mask = _loss_mask(src_masks, pred_logits, target_masks,
                               row_tile=self.row_tile)
        return {'loss_mask': loss_mask}

    def forward(self, outputs, targets):
        losses = {}
        losses.update(self.loss_masks_refer(outputs, targets))
        return losses

    __call__ = forward


# ----------------------------------------------------------------------------
if __name__ == "__main__":
    key = jax.random.PRNGKey(0)
    B, Hs, Ws, H, W = 2, 16, 16, 32, 32
    k1, k2, k3, k4 = jax.random.split(key, 4)

    pred_masks = jax.random.normal(k1, (B, 2, Hs, Ws), jnp.float32)
    pred_logits = jax.random.normal(k2, (B, 100, 2), jnp.float32)
    nt_label = jax.random.normal(k3, (B, 2), jnp.float32)   # unused by this loss
    gt = (jax.random.uniform(k4, (B, 1, H, W)) > 0.5).astype(jnp.float32)

    outputs = {'pred_masks': pred_masks,
               'pred_logits': pred_logits,
               'nt_label': nt_label}
    targets = [{'gt_mask_merged': gt[b], 'empty': jnp.array(0.0, jnp.float32)}
               for b in range(B)]

    # single-tile path (heuristic picks TH == H at this size)
    crit = ReferringCriterion(weight_dict={'loss_mask': 1.0}, losses=['masks'])
    loss_single = crit(outputs, targets)['loss_mask']
    jax.block_until_ready(loss_single)

    # multi-row-tile path (exercises grid=(B, H//TH) accumulation / finalize)
    crit_tiled = ReferringCriterion(weight_dict={'loss_mask': 1.0},
                                    losses=['masks'], row_tile=8)
    loss_tiled = crit_tiled(outputs, targets)['loss_mask']
    jax.block_until_ready(loss_tiled)

    assert abs(float(loss_single) - float(loss_tiled)) < 1e-3 * (
        1.0 + abs(float(loss_single)))
    print("KERNEL_OK")
</pallas_src>

<mosaic_0001>
module attributes {stable_mosaic.version = 11 : i64} {
  func.func private @main(%arg0: i32) attributes {dimension_semantics = [#tpu.dimension_semantics<core_parallel>], iteration_bounds = array<i64: 2>, tpu.core_type = #tpu.core_type<sc_scalar_subcore>, window_params = []} {
    return
  }
}

module attributes {stable_mosaic.version = 11 : i64} {
  func.func private @main(%arg0: i32) attributes {dimension_semantics = [#tpu.dimension_semantics<core_parallel>], iteration_bounds = array<i64: 2>, tpu.core_type = #tpu.core_type<sc_scalar_subcore>, window_params = []} {
    return
  }
}

module attributes {stable_mosaic.version = 11 : i64} {
  func.func @_fused_loss_kernel(%arg0: i32, %arg1: i32, %arg2: memref<1x16x16xbf16, #tpu.memory_space<vmem>>, %arg3: memref<1x10x10xf32, #tpu.memory_space<vmem>>, %arg4: memref<1x32x32xbf16, #tpu.memory_space<vmem>>, %arg5: memref<32x16xbf16, #tpu.memory_space<vmem>>, %arg6: memref<16x32xbf16, #tpu.memory_space<vmem>>, %arg7: memref<1x16x32xbf16, #tpu.memory_space<vmem>>, %arg8: memref<32x10xbf16, #tpu.memory_space<vmem>>, %arg9: memref<1x8x128xf32, #tpu.memory_space<vmem>>, %arg10: memref<16x32xbf16, #tpu.memory_space<vmem>>, %arg11: memref<16x32xf32, #tpu.memory_space<vmem>>) attributes {dimension_semantics = [#tpu.dimension_semantics<parallel>, #tpu.dimension_semantics<arbitrary>], iteration_bounds = array<i64: 2, 1>, scalar_prefetch = 0 : i64, scratch_operands = 2 : i64, tpu.core_type = #tpu.core_type<tc>, window_params = [{transform_indices = @transform_0, window_bounds = array<i64: 1, 16, 16>}, {transform_indices = @transform_1, window_bounds = array<i64: 1, 10, 10>}, {transform_indices = @transform_2, window_bounds = array<i64: 1, 32, 32>}, {transform_indices = @transform_3, window_bounds = array<i64: 32, 16>}, {pipeline_mode = #tpu.pipeline_mode<synchronous>, transform_indices = @transform_4, window_bounds = array<i64: 16, 32>}, {transform_indices = @transform_5, window_bounds = array<i64: 1, 16, 32>}, {pipeline_mode = #tpu.pipeline_mode<synchronous>, transform_indices = @transform_6, window_bounds = array<i64: 32, 10>}, {transform_indices = @transform_7, window_bounds = array<i64: 1, 8, 128>}]} {
    %c0_i32 = arith.constant 0 : i32
    %0 = arith.cmpi eq, %arg1, %c0_i32 : i32
    %1 = arith.extui %0 : i1 to i32
    %c0_i32_0 = arith.constant 0 : i32
    %2 = arith.cmpi ne, %1, %c0_i32_0 : i32
    scf.if %2 {
      %c0_39 = arith.constant 0 : index
      %c0_40 = arith.constant 0 : index
      %c0_41 = arith.constant 0 : index
      %69 = vector.load %arg2[%c0_39, %c0_40, %c0_41] : memref<1x16x16xbf16, #tpu.memory_space<vmem>>, vector<1x16x16xbf16>
      %70 = vector.shape_cast %69 : vector<1x16x16xbf16> to vector<16x16xbf16>
      %c0_42 = arith.constant 0 : index
      %c0_43 = arith.constant 0 : index
      %71 = vector.load %arg6[%c0_42, %c0_43] : memref<16x32xbf16, #tpu.memory_space<vmem>>, vector<16x32xbf16>
      %cst_44 = arith.constant dense<0.000000e+00> : vector<16x32xf32>
      %72 = tpu.matmul %70, %71, %cst_44 {dimension_numbers = #tpu.dot_dimension_numbers<[1], [0], [0], [1], [0, 0, 1, 1], [], []>} : vector<16x16xbf16>, vector<16x32xbf16>, vector<16x32xf32> -> vector<16x32xf32>
      %73 = arith.truncf %72 : vector<16x32xf32> to vector<16x32xbf16>
      %c0_45 = arith.constant 0 : index
      %c0_46 = arith.constant 0 : index
      %74 = vector.load %arg10[%c0_45, %c0_46] : memref<16x32xbf16, #tpu.memory_space<vmem>>, vector<16x32xbf16>
      tpu.vector_store %arg10[%c0_45, %c0_46], %73 {strides = array<i32>} : memref<16x32xbf16, #tpu.memory_space<vmem>>, vector<16x32xbf16>,
      %cst_47 = arith.constant 0.000000e+00 : f32
      %75 = vector.broadcast %cst_47 : f32 to vector<16x32xf32>
      %c0_48 = arith.constant 0 : index
      %c0_49 = arith.constant 0 : index
      %76 = vector.load %arg11[%c0_48, %c0_49] : memref<16x32xf32, #tpu.memory_space<vmem>>, vector<16x32xf32>
      tpu.vector_store %arg11[%c0_48, %c0_49], %75 {strides = array<i32>} : memref<16x32xf32, #tpu.memory_space<vmem>>, vector<16x32xf32>,
      %cst_50 = arith.constant 0.000000e+00 : f32
      %77 = vector.broadcast %cst_50 : f32 to vector<1x8x128xf32>
      %c0_51 = arith.constant 0 : index
      %c0_52 = arith.constant 0 : index
      %c0_53 = arith.constant 0 : index
      %78 = vector.load %arg9[%c0_51, %c0_52, %c0_53] : memref<1x8x128xf32, #tpu.memory_space<vmem>>, vector<1x8x128xf32>
      tpu.vector_store %arg9[%c0_51, %c0_52, %c0_53], %77 {strides = array<i32>} : memref<1x8x128xf32, #tpu.memory_space<vmem>>, vector<1x8x128xf32>,
    } else {
    }
    %c0 = arith.constant 0 : index
    %c0_1 = arith.constant 0 : index
    %3 = vector.load %arg5[%c0, %c0_1] : memref<32x16xbf16, #tpu.memory_space<vmem>>, vector<32x16xbf16>
    %c0_2 = arith.constant 0 : index
    %c0_3 = arith.constant 0 : index
    %4 = vector.load %arg10[%c0_2, %c0_3] : memref<16x32xbf16, #tpu.memory_space<vmem>>, vector<16x32xbf16>
    %cst = arith.constant dense<0.000000e+00> : vector<32x32xf32>
    %5 = tpu.matmul %3, %4, %cst {dimension_numbers = #tpu.dot_dimension_numbers<[1], [0], [0], [1], [0, 0, 1, 1], [], []>} : vector<32x16xbf16>, vector<16x32xbf16>, vector<32x32xf32> -> vector<32x32xf32>
    %c0_4 = arith.constant 0 : index
    %c0_5 = arith.constant 0 : index
    %c0_6 = arith.constant 0 : index
    %6 = vector.load %arg4[%c0_4, %c0_5, %c0_6] : memref<1x32x32xbf16, #tpu.memory_space<vmem>>, vector<1x32x32xbf16>
    %7 = vector.shape_cast %6 : vector<1x32x32xbf16> to vector<32x32xbf16>
    %8 = arith.extf %7 : vector<32x32xbf16> to vector<32x32xf32>
    %cst_7 = arith.constant 2.000000e+00 : f32
    %9 = vector.broadcast %cst_7 : f32 to vector<32x32xf32>
    %10 = arith.mulf %9, %8 : vector<32x32xf32>
    %cst_8 = arith.constant 1.000000e+00 : f32
    %11 = vector.broadcast %cst_8 : f32 to vector<32x32xf32>
    %12 = arith.subf %11, %10 : vector<32x32xf32>
    %13 = arith.mulf %5, %12 : vector<32x32xf32>
    %cst_9 = arith.constant 0.000000e+00 : f32
    %14 = vector.broadcast %cst_9 : f32 to vector<32x32xf32>
    %15 = arith.maximumf %13, %14 : vector<32x32xf32>
    %16 = math.absf %13 : vector<32x32xf32>
    %cst_10 = arith.constant 0.000000e+00 : f32
    %17 = vector.broadcast %cst_10 : f32 to vector<32x32xf32>
    %18 = arith.subf %17, %16 : vector<32x32xf32>
    %19 = math.exp %18 : vector<32x32xf32>
    %cst_11 = arith.constant 1.000000e+00 : f32
    %20 = vector.broadcast %cst_11 : f32 to vector<32x32xf32>
    %21 = arith.addf %20, %19 : vector<32x32xf32>
    %22 = math.log %21 : vector<32x32xf32>
    %23 = arith.addf %15, %22 : vector<32x32xf32>
    %24 = vector.shape_cast %23 : vector<32x32xf32> to vector<1x32x32xf32>
    %cst_12 = arith.constant dense<0.000000e+00> : vector<1xf32>
    %25 = vector.multi_reduction <add>, %24, %cst_12 [1, 2] : vector<1x32x32xf32> to vector<1xf32>
    %26 = vector.shape_cast %25 : vector<1xf32> to vector<1x1x1xf32>
    %27 = vector.extract %26[0, 0, 0] : f32 from vector<1x1x1xf32>
    %cst_13 = arith.constant 0.899999976 : f32
    %28 = arith.mulf %cst_13, %27 : f32
    %29 = arith.mulf %8, %23 : vector<32x32xf32>
    %30 = vector.shape_cast %29 : vector<32x32xf32> to vector<1x32x32xf32>
    %cst_14 = arith.constant dense<0.000000e+00> : vector<1xf32>
    %31 = vector.multi_reduction <add>, %30, %cst_14 [1, 2] : vector<1x32x32xf32> to vector<1xf32>
    %32 = vector.shape_cast %31 : vector<1xf32> to vector<1x1x1xf32>
    %33 = vector.extract %32[0, 0, 0] : f32 from vector<1x1x1xf32>
    %cst_15 = arith.constant 2.000000e-01 : f32
    %34 = arith.mulf %cst_15, %33 : f32
    %35 = arith.addf %28, %34 : f32
    %36 = vector.shape_cast %8 : vector<32x32xf32> to vector<1x32x32xf32>
    %cst_16 = arith.constant dense<0.000000e+00> : vector<1xf32>
    %37 = vector.multi_reduction <add>, %36, %cst_16 [1, 2] : vector<1x32x32xf32> to vector<1xf32>
    %38 = vector.shape_cast %37 : vector<1xf32> to vector<1x1x1xf32>
    %39 = vector.extract %38[0, 0, 0] : f32 from vector<1x1x1xf32>
    %cst_17 = arith.constant 2.000000e-01 : f32
    %40 = arith.mulf %cst_17, %39 : f32
    %cst_18 = arith.constant 921.599975 : f32
    %41 = arith.addf %cst_18, %40 : f32
    %42 = tpu.iota {dimensions = array<i32: 0>} : vector<8x128xi32>
    %c0_i32_19 = arith.constant 0 : i32
    %43 = vector.broadcast %c0_i32_19 : i32 to vector<8x128xi32>
    %44 = arith.cmpi eq, %42, %43 : vector<8x128xi32>
    %cst_20 = arith.constant 0.000000e+00 : f32
    %45 = vector.broadcast %35 : f32 to vector<8x128xf32>
    %46 = vector.broadcast %cst_20 : f32 to vector<8x128xf32>
    %47 = arith.select %44, %45, %46 : vector<8x128xi1>, vector<8x128xf32>
    %c1_i32 = arith.constant 1 : i32
    %48 = vector.broadcast %c1_i32 : i32 to vector<8x128xi32>
    %49 = arith.cmpi eq, %42, %48 : vector<8x128xi32>
    %cst_21 = arith.constant 0.000000e+00 : f32
    %50 = vector.broadcast %41 : f32 to vector<8x128xf32>
    %51 = vector.broadcast %cst_21 : f32 to vector<8x128xf32>
    %52 = arith.select %49, %50, %51 : vector<8x128xi1>, vector<8x128xf32>
    %53 = arith.addf %47, %52 : vector<8x128xf32>
    %c0_22 = arith.constant 0 : index
    %c0_23 = arith.constant 0 : index
    %c0_24 = arith.constant 0 : index
    %54 = vector.load %arg9[%c0_22, %c0_23, %c0_24] : memref<1x8x128xf32, #tpu.memory_space<vmem>>, vector<1x8x128xf32>
    %55 = vector.shape_cast %53 : vector<8x128xf32> to vector<1x8x128xf32>
    %56 = arith.addf %54, %55 : vector<1x8x128xf32>
    %c0_25 = arith.constant 0 : index
    %c0_26 = arith.constant 0 : index
    %c0_27 = arith.constant 0 : index
    %57 = vector.load %arg9[%c0_25, %c0_26, %c0_27] : memref<1x8x128xf32, #tpu.memory_space<vmem>>, vector<1x8x128xf32>
    tpu.vector_store %arg9[%c0_25, %c0_26, %c0_27], %56 {strides = array<i32>} : memref<1x8x128xf32, #tpu.memory_space<vmem>>, vector<1x8x128xf32>,
    %cst_28 = arith.constant 1.000000e+00 : bf16
    %58 = vector.broadcast %cst_28 : bf16 to vector<32x32xbf16>
    %59 = arith.subf %58, %7 : vector<32x32xbf16>
    %c0_29 = arith.constant 0 : index
    %c0_30 = arith.constant 0 : index
    %60 = vector.load %arg11[%c0_29, %c0_30] : memref<16x32xf32, #tpu.memory_space<vmem>>, vector<16x32xf32>
    %c0_31 = arith.constant 0 : index
    %c0_32 = arith.constant 0 : index
    %c0_33 = arith.constant 0 : index
    %61 = vector.load %arg7[%c0_31, %c0_32, %c0_33] : memref<1x16x32xbf16, #tpu.memory_space<vmem>>, vector<1x16x32xbf16>
    %62 = vector.shape_cast %61 : vector<1x16x32xbf16> to vector<16x32xbf16>
    %cst_34 = arith.constant dense<0.000000e+00> : vector<16x32xf32>
    %63 = tpu.matmul %62, %59, %cst_34 {dimension_numbers = #tpu.dot_dimension_numbers<[1], [0], [0], [1], [0, 0, 1, 1], [], []>} : vector<16x32xbf16>, vector<32x32xbf16>, vector<16x32xf32> -> vector<16x32xf32>
    %64 = arith.addf %60, %63 : vector<16x32xf32>
    %c0_35 = arith.constant 0 : index
    %c0_36 = arith.constant 0 : index
    %65 = vector.load %arg11[%c0_35, %c0_36] : memref<16x32xf32, #tpu.memory_space<vmem>>, vector<16x32xf32>
    tpu.vector_store %arg11[%c0_35, %c0_36], %64 {strides = array<i32>} : memref<16x32xf32, #tpu.memory_space<vmem>>, vector<16x32xf32>,
    %c0_i32_37 = arith.constant 0 : i32
    %66 = arith.cmpi eq, %arg1, %c0_i32_37 : i32
    %67 = arith.extui %66 : i1 to i32
    %c0_i32_38 = arith.constant 0 : i32
    %68 = arith.cmpi ne, %67, %c0_i32_38 : i32
    scf.if %68 {
      %c0_39 = arith.constant 0 : index
      %c0_40 = arith.constant 0 : index
      %69 = vector.load %arg11[%c0_39, %c0_40] : memref<16x32xf32, #tpu.memory_space<vmem>>, vector<16x32xf32>
      %70 = arith.truncf %69 : vector<16x32xf32> to vector<16x32xbf16>
      %c0_41 = arith.constant 0 : index
      %c0_42 = arith.constant 0 : index
      %71 = vector.load %arg8[%c0_41, %c0_42] : memref<32x10xbf16, #tpu.memory_space<vmem>>, vector<32x10xbf16>
      %cst_43 = arith.constant dense<0.000000e+00> : vector<16x10xf32>
      %72 = tpu.matmul %70, %71, %cst_43 {dimension_numbers = #tpu.dot_dimension_numbers<[1], [0], [0], [1], [0, 0, 1, 1], [], []>} : vector<16x32xbf16>, vector<32x10xbf16>, vector<16x10xf32> -> vector<16x10xf32>
      %73 = vector.extract_strided_slice %72 {offsets = [0, 0], sizes = [10, 10], strides = [1, 1]} : vector<16x10xf32> to vector<10x10xf32>
      %cst_44 = arith.constant 0.000000e+00 : f32
      %74 = vector.broadcast %cst_44 : f32 to vector<10x10xf32>
      %75 = arith.cmpf ole, %73, %74 : vector<10x10xf32>
      %cst_45 = arith.constant 1.000000e+00 : f32
      %cst_46 = arith.constant 0.000000e+00 : f32
      %76 = vector.broadcast %cst_45 : f32 to vector<10x10xf32>
      %77 = vector.broadcast %cst_46 : f32 to vector<10x10xf32>
      %78 = arith.select %75, %76, %77 : vector<10x10xi1>, vector<10x10xf32>
      %c0_47 = arith.constant 0 : index
      %c0_48 = arith.constant 0 : index
      %c0_49 = arith.constant 0 : index
      %79 = vector.load %arg3[%c0_47, %c0_48, %c0_49] : memref<1x10x10xf32, #tpu.memory_space<vmem>>, vector<1x10x10xf32>
      %80 = vector.shape_cast %79 : vector<1x10x10xf32> to vector<10x10xf32>
      %cst_50 = arith.constant 2.000000e+00 : f32
      %81 = vector.broadcast %cst_50 : f32 to vector<10x10xf32>
      %82 = arith.mulf %81, %78 : vector<10x10xf32>
      %cst_51 = arith.constant 1.000000e+00 : f32
      %83 = vector.broadcast %cst_51 : f32 to vector<10x10xf32>
      %84 = arith.subf %83, %82 : vector<10x10xf32>
      %85 = arith.mulf %80, %84 : vector<10x10xf32>
      %cst_52 = arith.constant 0.000000e+00 : f32
      %86 = vector.broadcast %cst_52 : f32 to vector<10x10xf32>
      %87 = arith.maximumf %85, %86 : vector<10x10xf32>
      %88 = math.absf %85 : vector<10x10xf32>
      %cst_53 = arith.constant 0.000000e+00 : f32
      %89 = vector.broadcast %cst_53 : f32 to vector<10x10xf32>
      %90 = arith.subf %89, %88 : vector<10x10xf32>
      %91 = math.exp %90 : vector<10x10xf32>
      %cst_54 = arith.constant 1.000000e+00 : f32
      %92 = vector.broadcast %cst_54 : f32 to vector<10x10xf32>
      %93 = arith.addf %92, %91 : vector<10x10xf32>
      %94 = math.log %93 : vector<10x10xf32>
      %95 = arith.addf %87, %94 : vector<10x10xf32>
      %96 = vector.shape_cast %95 : vector<10x10xf32> to vector<1x10x10xf32>
      %cst_55 = arith.constant dense<0.000000e+00> : vector<1xf32>
      %97 = vector.multi_reduction <add>, %96, %cst_55 [1, 2] : vector<1x10x10xf32> to vector<1xf32>
      %98 = vector.shape_cast %97 : vector<1xf32> to vector<1x1x1xf32>
      %99 = vector.extract %98[0, 0, 0] : f32 from vector<1x1x1xf32>
      %cst_56 = arith.constant 0.899999976 : f32
      %100 = arith.mulf %cst_56, %99 : f32
      %101 = arith.mulf %78, %95 : vector<10x10xf32>
      %102 = vector.shape_cast %101 : vector<10x10xf32> to vector<1x10x10xf32>
      %cst_57 = arith.constant dense<0.000000e+00> : vector<1xf32>
      %103 = vector.multi_reduction <add>, %102, %cst_57 [1, 2] : vector<1x10x10xf32> to vector<1xf32>
      %104 = vector.shape_cast %103 : vector<1xf32> to vector<1x1x1xf32>
      %105 = vector.extract %104[0, 0, 0] : f32 from vector<1x1x1xf32>
      %cst_58 = arith.constant 2.000000e-01 : f32
      %106 = arith.mulf %cst_58, %105 : f32
      %107 = arith.addf %100, %106 : f32
      %108 = vector.shape_cast %78 : vector<10x10xf32> to vector<1x10x10xf32>
      %cst_59 = arith.constant dense<0.000000e+00> : vector<1xf32>
      %109 = vector.multi_reduction <add>, %108, %cst_59 [1, 2] : vector<1x10x10xf32> to vector<1xf32>
      %110 = vector.shape_cast %109 : vector<1xf32> to vector<1x1x1xf32>
      %111 = vector.extract %110[0, 0, 0] : f32 from vector<1x1x1xf32>
      %cst_60 = arith.constant 2.000000e-01 : f32
      %112 = arith.mulf %cst_60, %111 : f32
      %cst_61 = arith.constant 9.000000e+01 : f32
      %113 = arith.addf %cst_61, %112 : f32
      %c2_i32 = arith.constant 2 : i32
      %114 = vector.broadcast %c2_i32 : i32 to vector<8x128xi32>
      %115 = arith.cmpi eq, %42, %114 : vector<8x128xi32>
      %cst_62 = arith.constant 0.000000e+00 : f32
      %116 = vector.broadcast %107 : f32 to vector<8x128xf32>
      %117 = vector.broadcast %cst_62 : f32 to vector<8x128xf32>
      %118 = arith.select %115, %116, %117 : vector<8x128xi1>, vector<8x128xf32>
      %c3_i32 = arith.constant 3 : i32
      %119 = vector.broadcast %c3_i32 : i32 to vector<8x128xi32>
      %120 = arith.cmpi eq, %42, %119 : vector<8x128xi32>
      %cst_63 = arith.constant 0.000000e+00 : f32
      %121 = vector.broadcast %113 : f32 to vector<8x128xf32>
      %122 = vector.broadcast %cst_63 : f32 to vector<8x128xf32>
      %123 = arith.select %120, %121, %122 : vector<8x128xi1>, vector<8x128xf32>
      %124 = arith.addf %118, %123 : vector<8x128xf32>
      %c0_64 = arith.constant 0 : index
      %c0_65 = arith.constant 0 : index
      %c0_66 = arith.constant 0 : index
      %125 = vector.load %arg9[%c0_64, %c0_65, %c0_66] : memref<1x8x128xf32, #tpu.memory_space<vmem>>, vector<1x8x128xf32>
      %126 = vector.shape_cast %124 : vector<8x128xf32> to vector<1x8x128xf32>
      %127 = arith.addf %125, %126 : vector<1x8x128xf32>
      %c0_67 = arith.constant 0 : index
      %c0_68 = arith.constant 0 : index
      %c0_69 = arith.constant 0 : index
      %128 = vector.load %arg9[%c0_67, %c0_68, %c0_69] : memref<1x8x128xf32, #tpu.memory_space<vmem>>, vector<1x8x128xf32>
      tpu.vector_store %arg9[%c0_67, %c0_68, %c0_69], %127 {strides = array<i32>} : memref<1x8x128xf32, #tpu.memory_space<vmem>>, vector<1x8x128xf32>,
    } else {
    }
    return
  }
  func.func @transform_0(%arg0: i32, %arg1: i32) -> (i32, i32, i32) {
    %c0_i32 = arith.constant 0 : i32
    %c0_i32_0 = arith.constant 0 : i32
    %c0_i32_1 = arith.constant 0 : i32
    return %arg0, %c0_i32, %c0_i32_0 : i32, i32, i32
  }
  func.func @transform_1(%arg0: i32, %arg1: i32) -> (i32, i32, i32) {
    %c0_i32 = arith.constant 0 : i32
    %c0_i32_0 = arith.constant 0 : i32
    %c0_i32_1 = arith.constant 0 : i32
    return %arg0, %c0_i32, %c0_i32_0 : i32, i32, i32
  }
  func.func @transform_2(%arg0: i32, %arg1: i32) -> (i32, i32, i32) {
    %c0_i32 = arith.constant 0 : i32
    %c0_i32_0 = arith.constant 0 : i32
    return %arg0, %arg1, %c0_i32 : i32, i32, i32
  }
  func.func @transform_3(%arg0: i32, %arg1: i32) -> (i32, i32) {
    %c0_i32 = arith.constant 0 : i32
    %c0_i32_0 = arith.constant 0 : i32
    return %arg1, %c0_i32 : i32, i32
  }
  func.func @transform_4(%arg0: i32, %arg1: i32) -> (i32, i32) {
    %c0_i32 = arith.constant 0 : i32
    %c0_i32_0 = arith.constant 0 : i32
    %c0_i32_1 = arith.constant 0 : i32
    return %c0_i32, %c0_i32_0 : i32, i32
  }
  func.func @transform_5(%arg0: i32, %arg1: i32) -> (i32, i32, i32) {
    %c0_i32 = arith.constant 0 : i32
    %c0_i32_0 = arith.constant 0 : i32
    %c0_i32_1 = arith.constant 0 : i32
    return %arg1, %c0_i32, %c0_i32_0 : i32, i32, i32
  }
  func.func @transform_6(%arg0: i32, %arg1: i32) -> (i32, i32) {
    %c0_i32 = arith.constant 0 : i32
    %c0_i32_0 = arith.constant 0 : i32
    %c0_i32_1 = arith.constant 0 : i32
    return %c0_i32, %c0_i32_0 : i32, i32
  }
  func.func @transform_7(%arg0: i32, %arg1: i32) -> (i32, i32, i32) {
    %c0_i32 = arith.constant 0 : i32
    %c0_i32_0 = arith.constant 0 : i32
    %c0_i32_1 = arith.constant 0 : i32
    return %arg0, %c0_i32, %c0_i32_0 : i32, i32, i32
  }
}

</mosaic_0001>

<bundles_post_ra>
// kernel: _loss_mask_impl.1
= control target key start
LH: loop header
LB: loop body
LE: loop exit
PB: predicated region body
PF: predicated region fallthrough
CT: control target
= control target key end

     0   :  { %s1209_s24 = smov 0   ;;  %s1211_s25 = smov 0   ;;  %s1378_s0 = inlined_call_operand.vmem [shape: bf16[2,16,16], index: 0, kind: input, shape index: {}]   ;;  %s1379_s1 = inlined_call_operand.vmem [shape: f32[2,10,10], index: 1, kind: input, shape index: {}]   ;;  %s1380_s2 = inlined_call_operand.vmem [shape: bf16[2,32,32], index: 2, kind: input, shape index: {}]   ;;  %s1381_s3 = inlined_call_operand.vmem [shape: bf16[32,16], index: 3, kind: input, shape index: {}]   ;;  %s1382_s4 = inlined_call_operand.vmem [shape: bf16[16,32], index: 4, kind: input, shape index: {}]   ;;  %s1383_s5 = inlined_call_operand.vmem [shape: bf16[1,16,32], index: 5, kind: input, shape index: {}]   ;;  %s1384_s6 = inlined_call_operand.vmem [shape: bf16[32,10], index: 6, kind: input, shape index: {}]   ;;  %s1385_s7 = inlined_call_operand.vmem [shape: f32[2,8,128], index: 7, kind: output, shape index: {}]  }
   0x1   :  { %s1213_s26 = smov 0  }
   0x2 LB: > { %s29_s27 = sadd.s32 1, %s1161_s25  ;;  %p1008_p0 = scmp.ge.s32.totalorder %s1165_s26, 1  ;;  %s1165_s26 = sphi %s1213_s26, %s17_s26   ;;  %s1161_s25 = sphi %s1211_s25, %s1387_s25   ;;  %s1157_s24 = sphi %s1209_s24, %s1386_s24  }
   0x3   : > { %p31_p1 = scmp.ge.s32.totalorder %s29_s27, 2  ;;  %p297_p2 = scmp.lt.s32.totalorder %s1165_s26, 3 }
   0x5   : > { %s1389_s27 = smov (%p31_p1, %s29_s27), 0  ;;  %p298_p3 = pnand %p1008_p0, %p297_p2 }
   0x6   : > { %v1112_v0 = vld [vmem:[%s1382_s4] sm:$0xff] (!%p298_p3)   ;;  %v1167_v1 = vmov (!%p298_p3), 0.0   ;;  %p352_p4 = scmp.lt.s32.totalorder (!%p298_p3), %s1157_s24, 1  ;;  %vm454_vm0 = vcmask (!%p298_p3), 261120   ;;  %vm1168_vm1 = vmmov (!%p298_p3), 0   ;;  %vm408_vm2 = vcmask (!%p298_p3), 130048  }
   0x7   : > { %301 = sbr.rel (%p298_p3) target bundleno = 734 (0x2de), region = 48  ;;  %1046 = vmatprep.subr.bf16.mxu0 (!%p298_p3), %v1167_v1  ;;  %1048 = vmatprep.mubr.msk.bf16.mxu0 (!%p298_p3), %vm1168_vm1, %v1167_v1  ;;  %456 = vst.msk [vmem:[#allocation3] sm:$0xff] (!%p298_p3), %vm454_vm0, %v1167_v1  ;;  %457 = vst.msk [vmem:[#allocation3 + $0x8] sm:$0xff] (!%p298_p3), %vm454_vm0, %v1167_v1  ;;  %v1114_v13 = vld [vmem:[%s1383_s5] sm:$0xff] (!%p298_p3)   ;;  %v1116_v27 = vld [vmem:[%s1381_s3 + $0x8] sm:$0xff] (!%p298_p3)   ;;  %vm825_vm4 = vcmask (!%p298_p3), 80896  }
   0x8   : > { %1047 = vmatpush3.bf16.msra.mxu0 (!%p298_p3), %v1112_v0  ;;  %v1115_v14 = vld [vmem:[%s1381_s3] sm:$0xff] (!%p298_p3)   ;;  %v1118_v31 = vld [vmem:[%s1384_s6 + $0x8] sm:$0xff] (!%p298_p3)   ;;  %vm827_vm5 = vcmask (!%p298_p3), 74752  }
   0x9   : > { %1058 = vmatprep.subr.bf16.mxu0 (!%p298_p3), %v1167_v1  ;;  %1054 = vmatprep.mubr.msk.bf16.mxu1 (!%p298_p3), %vm408_vm2, %v1115_v14  ;;  %v1117_v30 = vld [vmem:[%s1384_s6] sm:$0xff] (!%p298_p3)  }
   0xe   : > { %s1391_s24 = smov (!%p352_p4, %s1157_s24), 1  ;;  %v660_v20 = vld [vmem:[#allocation3] sm:$0xff]  ;;  %v661_v22 = vld [vmem:[#allocation3 + $0x8] sm:$0xff] }
   0xf   : > { %s1032_s30 = sshll.u32 %s1391_s24, 3  ;;  %s1033_s8 = sshll.u32 %s1391_s24, 4 }
  0x10   : > { %s356_s11 = scalar_lea.vmem %s1378_s0, %s1032_s30  ;;  %s370_s14 = scalar_lea.vmem %s1380_s2, %s1033_s8 }
  0x11   : > { %v1113_v2 = vld [vmem:[%s356_s11] sm:$0xff]   ;;  %v532_v5 = vld [vmem:[%s370_s14 + $0x8] sm:$0xf]  ;;  %v533_v8 = vld [vmem:[%s370_s14 + $0xc] sm:$0xf]  ;;  %s361_s10 = scalar_lea.vmem %s1379_s1, %s1033_s8 }
  0x12   : > { %v530_v3 = vld [vmem:[%s370_s14] sm:$0xf]  ;;  %v531_v4 = vld [vmem:[%s370_s14 + $0x4] sm:$0xf]  ;;  %1049 = vmatmul.mubr.msk.bf16.vlgmr.msra.gmra.mrb[0].mxu0 %vm408_vm2, %v1113_v2  ;;  %v658_v9 = vsub.bf16 1065369472, %v532_v5  ;;  %v1286_v37 = vunpack.c.l.bf16 %v532_v5  ;;  %v1292_v41 = vunpack.c.l.bf16 %v533_v8 }
  0x13   : > { %v656_v6 = vsub.bf16 1065369472, %v530_v3  ;;  %v657_v7 = vsub.bf16 1065369472, %v531_v4  ;;  %v659_v10 = vsub.bf16 1065369472, %v533_v8  ;;  %1062 = vmatprep.mubr.msk.bf16.mxu0 %vm1168_vm1, %v1167_v1  ;;  %v1282_v35 = vunpack.c.l.bf16 %v530_v3 }
  0x14   : > { %v1284_v36 = vunpack.c.l.bf16 %v531_v4  ;;  %v629_v42 = vsel %vm454_vm0, %v1286_v37, 0.0  ;;  %v631_v44 = vsel %vm454_vm0, %v1292_v41, 0.0  ;;  %v540_v46 = vmul.f32 2.0, %v1286_v37 }
  0x15   : > { %v1024_v11 = vcombine.low %v656_v6, %v657_v7  ;;  %v1025_v12 = vcombine.low %v658_v9, %v659_v10  ;;  %v626_v38 = vsel %vm454_vm0, %v1282_v35, 0.0  ;;  %v538_v47 = vmul.f32 2.0, %v1282_v35 }
  0x16   : > { %v627_v39 = vsel %vm454_vm0, %v1284_v36, 0.0  ;;  %v541_v48 = vmul.f32 2.0, %v1292_v41  ;;  %v539_v49 = vmul.f32 2.0, %v1284_v36  ;;  %v544_v50 = vsub.f32 1.0, %v540_v46 }
  0x17   : > { %1059 = vmatpush3.bf16.msra.mxu0 %v1024_v11  ;;  %v628_v40 = vadd.f32 %v627_v39, %v626_v38  ;;  %v542_v51 = vsub.f32 1.0, %v538_v47 }
  0x18   : > { %1060 = vmatprep.subr.bf16.mxu0 %v1167_v1  ;;  %v545_v52 = vsub.f32 1.0, %v541_v48  ;;  %v543_v54 = vsub.f32 1.0, %v539_v49 }
  0x19   : > { %v630_v43 = vadd.f32 %v629_v42, %v628_v40 }
  0x1b   : > { %1061 = vmatpush3.bf16.msra.mxu0 %v1025_v12  ;;  %v632_v45 = vadd.f32 %v631_v44, %v630_v43 }
  0x1d   : > { %633 = vadd.xlane.f32.xlu1 %v632_v45 }
  0x1e   : > { %1063 = vmatmul.mubr.msk.bf16.vlgmr.msra.gmra.mrb[4].mxu0 %vm454_vm0, %v1114_v13 }
  0xe5   : > { %v446_v15 = vpop.f32.mrb[0].mxu0 }
  0xe6   : > { %v1050_v16 = vpop.f32.mrb[1].mxu0 }
  0xe7   : > { %v449_v17 = vpop.f32.mrb[2].mxu0 }
  0xe8   : > { %v453_v18 = vpack.c.bf16 %v449_v17, %v446_v15  ;;  %v1051_v19 = vpop.f32.mrb[3].mxu0  ;;  %v799_v17 = vld [vmem:[%s361_s10] sm:$0xff] }
  0xea   : > { %455 = vst.msk [vmem:[#allocation2] sm:$0xff] %vm454_vm0, %v453_v18 }
  0xf1   : > { %v718_v21 = vpop.f32.mrb[4].mxu0  ;;  %v463_v25 = vld [vmem:[#allocation2] sm:$0xff] }
  0xf2   : > { %v725_v23 = vadd.f32 %v718_v21, %v660_v20  ;;  %v1064_v24 = vpop.f32.mrb[5].mxu0  ;;  %1052 = vmatprep.subr.bf16.mxu1 %v463_v25 }
  0xf3   : > { %v721_v26 = vpop.f32.mrb[6].mxu0  ;;  %1053 = vmatpush3.bf16.msra.mxu1 %v463_v25 }
  0xf4   : > { %727 = vst.msk [vmem:[#allocation3] sm:$0xff] %vm454_vm0, %v725_v23  ;;  %v726_v28 = vadd.f32 %v721_v26, %v661_v22  ;;  %v1065_v29 = vpop.f32.mrb[7].mxu0  ;;  %1066 = vmatprep.subr.bf16.mxu1 %v1167_v1  ;;  %v800_v23 = vld [vmem:[%s361_s10 + $0x8] sm:$0x3] }
  0xf6   : > { %728 = vst.msk [vmem:[#allocation3 + $0x8] sm:$0xff] %vm454_vm0, %v726_v28  ;;  %1055 = vmatmul.mubr.msk.bf16.vlgmr.msra.gmra.mrb[0].mxu1 %vm408_vm2, %v1116_v27 }
  0xf7   : > { %1067 = vmatpush3.bf16.msra.mxu1 %v1117_v30  ;;  %1070 = vmatprep.mubr.msk.bf16.mxu1 %vm1168_vm1, %v1167_v1 }
  0xf8   : > { %1068 = vmatprep.subr.bf16.mxu1 %v1167_v1 }
  0xfb   : > { %1069 = vmatpush3.bf16.msra.mxu1 %v1118_v31  ;;  %v732_v32 = vld [vmem:[#allocation3] sm:$0xff] }
  0xfd   : > { %v733_v33 = vld [vmem:[#allocation3 + $0x8] sm:$0xff] }
  0xfe   : > { %v734_v34 = vpack.c.bf16 %v733_v33, %v732_v32 }
 0x100   : > { %1071 = vmatmul.mubr.msk.bf16.vlgmr.msra.gmra.mrb[4].mxu1 %vm454_vm0, %v734_v34 }
 0x1c9   : > { %v1056_v53 = vpop.f32.mrb[0].mxu1 }
 0x1ca   : > { %v1302_v55 = vmul.f32 %v1056_v53, %v544_v50  ;;  %v515_v56 = vpop.f32.mrb[1].mxu1 }
 0x1cb   : > { %v1304_v57 = vmul.f32 %v542_v51, %v515_v56  ;;  %v1057_v58 = vpop.f32.mrb[2].mxu1 }
 0x1cc   : > { %v556_v59 = vand.u32 2147483647, %v1302_v55  ;;  %v1307_v60 = vmul.f32 %v1057_v58, %v545_v52  ;;  %v518_v61 = vpop.f32.mrb[3].mxu1  ;;  %v552_v47 = vmax.f32 %v1302_v55, 0.0 }
 0x1cd   : > { %v554_v62 = vand.u32 2147483647, %v1304_v57  ;;  %v1310_v63 = vmul.f32 %v543_v54, %v518_v61  ;;  %v550_v50 = vmax.f32 %v1304_v57, 0.0 }
 0x1ce   : > { %v560_v0 = vsub.f32 0.0, %v556_v59  ;;  %v557_v2 = vand.u32 2147483647, %v1307_v60  ;;  %v553_v59 = vmax.f32 %v1307_v60, 0.0 }
 0x1cf   : > { %v558_v3 = vsub.f32 0.0, %v554_v62  ;;  %v555_v4 = vand.u32 2147483647, %v1310_v63  ;;  %v551_v61 = vmax.f32 %v1310_v63, 0.0 }
 0x1d0   : > { %v566_v5 = vmul.f32 1.442695, %v560_v0  ;;  %v561_v6 = vsub.f32 0.0, %v557_v2 }
 0x1d1   : > { %v562_v7 = vmul.f32 1.442695, %v558_v3  ;;  %v559_v8 = vsub.f32 0.0, %v555_v4 }
 0x1d2   : > { %1119 = vpow2.f32 %v566_v5  ;;  %v568_v9 = vmul.f32 1.442695, %v561_v6 }
 0x1d3   : > { %v788_v10 = vpop.f32.mrb[4].mxu1  ;;  %1121 = vpow2.f32 %v562_v7  ;;  %v564_v11 = vmul.f32 1.442695, %v559_v8 }
 0x1d4   : > { %vm795_vm3 = vcmp.le.f32.partialorder %v788_v10, 0.0  ;;  %v1072_v12 = vpop.f32.mrb[5].mxu1  ;;  %1123 = vpow2.f32 %v568_v9 }
 0x1d5   : > { %v1320_v13 = vsel %vm795_vm3, 1.0, %v1167_v1  ;;  %v791_v14 = vpop.f32.mrb[6].mxu1  ;;  %1125 = vpow2.f32 %v564_v11 }
 0x1d6   : > { %v801_v15 = vmul.f32 2.0, %v1320_v13  ;;  %vm796_vm6 = vcmp.le.f32.partialorder %v791_v14, 0.0  ;;  %v1073_v16 = vpop.f32.mrb[7].mxu1  ;;  %v856_v21 = vsel %vm825_vm4, %v1320_v13, 0.0 }
 0x1d7   : > { %v1324_v18 = vsel %vm796_vm6, 1.0, %v1167_v1 }
 0x1d8   : > { %v803_v19 = vsub.f32 1.0, %v801_v15  ;;  %v802_v20 = vmul.f32 2.0, %v1324_v18  ;;  %v857_v22 = vsel %vm827_vm5, %v1324_v18, 0.0 }
 0x1d9   : > { %v1331_v24 = vadd.f32 %v857_v22, %v856_v21 }
 0x1da   : > { %v1333_v25 = vmul.f32 %v803_v19, %v799_v17  ;;  %v804_v26 = vsub.f32 1.0, %v802_v20 }
 0x1dc   : > { %v809_v27 = vand.u32 2147483647, %v1333_v25  ;;  %v1336_v28 = vmul.f32 %v804_v26, %v800_v23  ;;  %v1120_v1 = vpop.eup %1119 }
 0x1dd   : > { %v1122_v29 = vpop.eup %1121  ;;  %v572_v30 = vadd.f32 1.0, %v1120_v1 }
 0x1de   : > { %v811_v31 = vsub.f32 0.0, %v809_v27  ;;  %v810_v32 = vand.u32 2147483647, %v1336_v28  ;;  %v1124_v33 = vpop.eup %1123  ;;  %v570_v34 = vadd.f32 1.0, %v1122_v29  ;;  %v808_v22 = vmax.f32 %v1336_v28, 0.0  ;;  %v634_v28 = vpop.xlane.xlu1 %633 }
 0x1df   : > { %v1126_v38 = vpop.eup %1125  ;;  %1127 = vlog2.f32 %v572_v30  ;;  %v573_v39 = vadd.f32 1.0, %v1124_v33 }
 0x1e0   : > { %v813_v40 = vmul.f32 1.442695, %v811_v31  ;;  %v812_v42 = vsub.f32 0.0, %v810_v32  ;;  %1129 = vlog2.f32 %v570_v34  ;;  %v571_v43 = vadd.f32 1.0, %v1126_v38 }
 0x1e1   : > { %1131 = vlog2.f32 %v573_v39  ;;  %v635_v38 = vrot.slane %v634_v28, 4 }
 0x1e2   : > { %v815_v44 = vmul.f32 1.442695, %v812_v42  ;;  %1133 = vlog2.f32 %v571_v43 }
 0x1e3   : > { %1135 = vpow2.f32 %v813_v40  ;;  %v636_v39 = vadd.f32 %v635_v38, %v634_v28 }
 0x1e4   : > { %1137 = vpow2.f32 %v815_v44 }
 0x1e5   : > { %v637_v42 = vrot.slane %v636_v39, 2 }
 0x1e9   : > { %v1128_v45 = vpop.eup %1127 }
 0x1ea   : > { %v1130_v46 = vpop.eup %1129  ;;  %v579_v48 = vmul.f32 0.6931472, %v1128_v45 }
 0x1eb   : > { %v1132_v49 = vpop.eup %1131  ;;  %v575_v51 = vmul.f32 0.6931472, %v1130_v46 }
 0x1ec   : > { %v1134_v52 = vpop.eup %1133  ;;  %v584_v53 = vadd.f32 %v579_v48, %v552_v47  ;;  %v581_v54 = vmul.f32 0.6931472, %v1132_v49  ;;  %v638_v48 = vadd.f32 %v637_v42, %v636_v39 }
 0x1ed   : > { %v1136_v56 = vpop.eup %1135  ;;  %v582_v58 = vadd.f32 %v575_v51, %v550_v50  ;;  %v577_v62 = vmul.f32 0.6931472, %v1134_v52 }
 0x1ee   : > { %v1138_v0 = vpop.eup %1137  ;;  %v817_v2 = vadd.f32 1.0, %v1136_v56  ;;  %v585_v5 = vadd.f32 %v581_v54, %v553_v59  ;;  %v606_v57 = vmul.f32 %v584_v53, %v1286_v37  ;;  %v590_v63 = vsel %vm454_vm0, %v584_v53, 0.0 }
 0x1ef   : > { %v604_v3 = vmul.f32 %v582_v58, %v1282_v35  ;;  %v583_v55 = vadd.f32 %v577_v62, %v551_v61  ;;  %v818_v4 = vadd.f32 1.0, %v1138_v0  ;;  %v587_v7 = vsel %vm454_vm0, %v582_v58, 0.0 }
 0x1f0   : > { %1139 = vlog2.f32 %v817_v2  ;;  %v607_v9 = vmul.f32 %v585_v5, %v1292_v41  ;;  %v592_v37 = vsel %vm454_vm0, %v585_v5, 0.0  ;;  %v807_v41 = vmax.f32 %v1333_v25, 0.0 }
 0x1f1   : > { %v605_v6 = vmul.f32 %v583_v55, %v1284_v36  ;;  %1141 = vlog2.f32 %v818_v4  ;;  %v588_v60 = vsel %vm454_vm0, %v583_v55, 0.0  ;;  %v608_v35 = vsel %vm454_vm0, %v604_v3, 0.0 }
 0x1f2   : > { %v589_v8 = vadd.f32 %v588_v60, %v587_v7  ;;  %v611_v36 = vsel %vm454_vm0, %v606_v57, 0.0  ;;  %v613_v16 = vsel %vm454_vm0, %v607_v9, 0.0 }
 0x1f3   : > { %v609_v10 = vsel %vm454_vm0, %v605_v6, 0.0 }
 0x1f4   : > { %v591_v11 = vadd.f32 %v590_v63, %v589_v8  ;;  %v610_v12 = vadd.f32 %v609_v10, %v608_v35 }
 0x1f6   : > { %v593_v14 = vadd.f32 %v592_v37, %v591_v11  ;;  %v612_v15 = vadd.f32 %v611_v36, %v610_v12  ;;  %v644_v37 = vlaneseq }
 0x1f8   : > { %594 = vadd.xlane.f32.xlu0 %v593_v14  ;;  %v614_v17 = vadd.f32 %v613_v16, %v612_v15  ;;  %v645_v36 = vshrl.u32 %v644_v37, 7 }
 0x1fa   : > { %v1140_v19 = vpop.eup %1139  ;;  %vm646_vm7 = vcmp.eq.s32.totalorder %v645_v36, 0  ;;  %vm649_vm8 = vcmp.eq.s32.totalorder %v645_v36, 1  ;;  %vm870_vm9 = vcmp.eq.s32.totalorder %v645_v36, 2  ;;  %vm873_vm10 = vcmp.eq.s32.totalorder %v645_v36, 3 }
 0x1fb   : > { %v1142_v20 = vpop.eup %1141  ;;  %v820_v21 = vmul.f32 0.6931472, %v1140_v19 }
 0x1fc   : > { %v822_v23 = vmul.f32 0.6931472, %v1142_v20  ;;  %615 = vadd.xlane.f32.xlu0 %v614_v17 }
 0x1fd   : > { %v823_v26 = vadd.f32 %v820_v21, %v807_v41 }
 0x1fe   : > { %v824_v27 = vadd.f32 %v822_v23, %v808_v22 }
 0x1ff   : > { %v840_v1 = vmul.f32 %v823_v26, %v1320_v13  ;;  %v826_v30 = vsel %vm825_vm4, %v823_v26, 0.0 }
 0x200   : > { %v841_v29 = vmul.f32 %v824_v27, %v1324_v18  ;;  %v828_v31 = vsel %vm827_vm5, %v824_v27, 0.0 }
 0x201   : > { %v829_v32 = vadd.f32 %v828_v31, %v826_v30  ;;  %v842_v33 = vsel %vm825_vm4, %v840_v1, 0.0 }
 0x202   : > { %v843_v25 = vsel %vm827_vm5, %v841_v29, 0.0 }
 0x203   : > { %830 = vadd.xlane.f32.xlu1 %v829_v32  ;;  %v844_v34 = vadd.f32 %v843_v25, %v842_v33 }
 0x205   : > { %845 = vadd.xlane.f32.xlu0 %v844_v34 }
 0x207   : > { %859 = vadd.xlane.f32.xlu1 %v1331_v24  ;;  %v639_v24 = vrot.slane %v638_v48, 1 }
 0x209   : > { %v640_v4 = vadd.f32 %v639_v24, %v638_v48 }
 0x285   : > { %v595_v13 = vpop.xlane.xlu0 %594 }
 0x286   : > { %v596_v40 = vrot.slane %v595_v13, 4 }
 0x288   : > { %v597_v18 = vadd.f32 %v596_v40, %v595_v13 }
 0x289   : > { %v616_v43 = vpop.xlane.xlu0 %615 }
 0x28a   : > { %v598_v44 = vrot.slane %v597_v18, 2  ;;  %v617_v45 = vrot.slane %v616_v43, 4 }
 0x28c   : > { %v618_v46 = vadd.f32 %v617_v45, %v616_v43  ;;  %v599_v47 = vadd.f32 %v598_v44, %v597_v18 }
 0x28e   : > { %v619_v49 = vrot.slane %v618_v46, 2  ;;  %v600_v50 = vrot.slane %v599_v47, 1 }
 0x290   : > { %v831_v51 = vpop.xlane.xlu1 %830  ;;  %v601_v52 = vadd.f32 %v600_v50, %v599_v47  ;;  %v620_v53 = vadd.f32 %v619_v49, %v618_v46 }
 0x291   : > { %v832_v54 = vrot.slane %v831_v51, 4 }
 0x292   : > { %v846_v56 = vpop.xlane.xlu0 %845  ;;  %1074 = vpush %v601_v52  ;;  %v621_v58 = vrot.slane %v620_v53, 1 }
 0x293   : > { %v833_v59 = vadd.f32 %v832_v54, %v831_v51  ;;  %v847_v61 = vrot.slane %v846_v56, 4 }
 0x294   : > { %v860_v62 = vpop.xlane.xlu1 %859  ;;  %v622_v0 = vadd.f32 %v621_v58, %v620_v53 }
 0x295   : > { %v834_v2 = vrot.slane %v833_v59, 2  ;;  %v848_v3 = vadd.f32 %v847_v61, %v846_v56  ;;  %v861_v55 = vrot.slane %v860_v62, 4 }
 0x296   : > { %1076 = vpush %v622_v0 }
 0x297   : > { %v849_v5 = vrot.slane %v848_v3, 2  ;;  %v862_v57 = vadd.f32 %v861_v55, %v860_v62  ;;  %1078 = vpush %v640_v4  ;;  %v835_v6 = vadd.f32 %v834_v2, %v833_v59 }
 0x299   : > { %v850_v7 = vadd.f32 %v849_v5, %v848_v3  ;;  %v863_v60 = vrot.slane %v862_v57, 2  ;;  %v836_v8 = vrot.slane %v835_v6, 1 }
 0x29b   : > { %v864_v63 = vadd.f32 %v863_v60, %v862_v57  ;;  %v837_v9 = vadd.f32 %v836_v8, %v835_v6  ;;  %v851_v35 = vrot.slane %v850_v7, 1 }
 0x29d   : > { %1080 = vpush %v837_v9  ;;  %v852_v10 = vadd.f32 %v851_v35, %v850_v7  ;;  %v865_v11 = vrot.slane %v864_v63, 1 }
 0x29f   : > { %1082 = vpush %v852_v10  ;;  %v866_v12 = vadd.f32 %v865_v11, %v864_v63 }
 0x2a1   : > { %1084 = vpush %v866_v12 }
 0x2c3   : > { %s1075_s8 = spop %1074 }
 0x2c4   : > { %s603_s11 = smul.f32 0.9, %s1075_s8  ;;  %s386_s8 = scalar_lea.vmem %s1385_s7, %s1032_s30 }
 0x2c7   : > { %s1077_s12 = spop %1076 }
 0x2c8   : > { %s624_s13 = smul.f32 0.2, %s1077_s12  ;;  %s1079_s14 = spop %1078 }
 0x2c9   : > { %s642_s15 = smul.f32 0.2, %s1079_s14 }
 0x2ca   : > { %s625_s16 = sadd.f32 %s624_s13, %s603_s11 }
 0x2cb   : > { %s643_s17 = sadd.f32 921.6, %s642_s15 }
 0x2cc   : > { %v647_v14 = vstv %s625_s16 }
 0x2cd   : > { %v650_v15 = vstv %s643_s17  ;;  %v648_v16 = vsel %vm646_vm7, %v647_v14, 0.0 }
 0x2ce   : > { %s1081_s18 = spop %1080  ;;  %v651_v17 = vsel %vm649_vm8, %v650_v15, 0.0 }
 0x2cf   : > { %s839_s19 = smul.f32 0.9, %s1081_s18  ;;  %v652_v19 = vadd.f32 %v651_v17, %v648_v16 }
 0x2d0   : > { %s1083_s20 = spop %1082 }
 0x2d1   : > { %s854_s21 = smul.f32 0.2, %s1083_s20 }
 0x2d2   : > { %s1085_s22 = spop %1084 }
 0x2d3   : > { %s855_s23 = sadd.f32 %s854_s21, %s839_s19  ;;  %s868_s28 = smul.f32 0.2, %s1085_s22 }
 0x2d5   : > { %v871_v20 = vstv %s855_s23  ;;  %s869_s29 = sadd.f32 90.0, %s868_s28 }
 0x2d6   : > { %v872_v21 = vsel %vm870_vm9, %v871_v20, 0.0 }
 0x2d7   : > { %v874_v41 = vstv %s869_s29 }
 0x2d8   : > { %v875_v22 = vsel %vm873_vm10, %v874_v41, 0.0 }
 0x2d9   : > { %v876_v23 = vadd.f32 %v875_v22, %v872_v21 }
 0x2db   : > { %v878_v26 = vadd.f32 %v876_v23, %v652_v19 }
 0x2dd   : > { %879 = vst [vmem:[%s386_s8] sm:$0xff] %v878_v26 }
 0x2de PF: > { %s17_s26 = sadd.s32 1, %s1165_s26   ;;  %s1386_s24 = smov %s1161_s25 }
 0x2df   : > { %p14_p5 = scmp.ge.s32.totalorder %s17_s26, 4   ;;  %s1387_s25 = smov %s1389_s27 }
 0x2e1   :  { %16 = sbr.rel (!%p14_p5) target bundleno = 2 (0x2), region = 98 }

</bundles_post_ra>
